<compile_context>
chip_gen: v5e
topology: v5e:2x2
jax: 0.10.0
libtpu: 0.0.40
codegen_flags: <defaults>
</compile_context>

<pallas_src>
import functools

import jax
import jax.numpy as jnp
from jax.experimental import pallas as pl
from jax.experimental.pallas import tpu as pltpu

LN_EPS = 1e-5  # PyTorch nn.LayerNorm default


def _fused_encoder_kernel(h_ref, w1_ref, w2_ref, sp_ref, o_ref, *, p_tr, p_re):
    """One batch tile: fused (tr | re) MLP + segment-masked LayerNorm.

    h_ref : (TB, D_in)            activations
    w1_ref: (D_in, 2H)            [tr_w1 | re_w1]
    w2_ref: (2H, P)               block-diag(tr_w2, re_w2), P = p_tr + p_re
    sp_ref: (8, Wp)               row0=b1_cat(2H), row1=b2_cat(P), row2=gamma(P), row3=beta(P)
    o_ref : (TB, P)               [tr_out | re_out]
    """
    P = p_tr + p_re
    h2 = w1_ref.shape[1]  # 2H (static)

    h = h_ref[...]                                   # (TB, D_in) f32

    # Lane-dense full-row loads of the packed small params, then static value slices.
    b1 = sp_ref[0:1, :][:, :h2]                      # (1, 2H)
    b2 = sp_ref[1:2, :][:, :P]                       # (1, P)
    gamma = sp_ref[2:3, :][:, :P]                    # (1, P)
    beta = sp_ref[3:4, :][:, :P]                     # (1, P)

    # Fused Linear 1 (both branches) + SiLU
    z = jnp.dot(h, w1_ref[...], preferred_element_type=jnp.float32) + b1
    a = z * jax.nn.sigmoid(z)                        # SiLU (EUP sigmoid + VPU mul)

    # Fused Linear 2 via block-diagonal W2
    y = jnp.dot(a, w2_ref[...], preferred_element_type=jnp.float32) + b2   # (TB, P)

    # Segment-masked LayerNorm over the whole (TB, P) slab:
    # one vreg stream, no lane-unaligned slices/concat, one store per tile.
    lane = jax.lax.broadcasted_iota(jnp.int32, y.shape, dimension=1)
    is_tr = lane < p_tr                              # (TB, P) segment mask
    inv_tr = jnp.float32(1.0 / p_tr)
    inv_re = jnp.float32(1.0 / p_re)
    zero = jnp.zeros_like(y)

    sum_tr = jnp.sum(jnp.where(is_tr, y, zero), axis=-1, keepdims=True)
    sum_re = jnp.sum(jnp.where(is_tr, zero, y), axis=-1, keepdims=True)
    mean = jnp.where(is_tr, sum_tr * inv_tr, sum_re * inv_re)   # per-lane segment mean

    d = y - mean
    d2 = d * d
    ss_tr = jnp.sum(jnp.where(is_tr, d2, zero), axis=-1, keepdims=True)
    ss_re = jnp.sum(jnp.where(is_tr, zero, d2), axis=-1, keepdims=True)
    var = jnp.where(is_tr, ss_tr * inv_tr, ss_re * inv_re)      # biased var, like torch

    yn = d * jax.lax.rsqrt(var + LN_EPS)
    o_ref[...] = yn * gamma + beta                   # single full-slab store


def _round_up(x, m):
    return ((x + m - 1) // m) * m


def fused_encode(h, w1_cat, w2_bd, small_params, p_tr, p_re, *, block_b=1024):
    """Returns (tr, re) = fused MLP+LayerNorm for both branches in one pallas_call."""
    B, D_in = h.shape
    P = p_tr + p_re

    # Batch-tile selection:
    #  - large tiles (up to block_b rows) to amortize per-grid-step overhead,
    #  - >= 2 tiles whenever 8-row alignment allows (megacore sharding on v7x),
    #  - no wrapper padding: partial last tile handled by Pallas writeback clipping.
    if B < 16:
        tb = B                                   # single tiny tile (block == full dim)
    else:
        half = _round_up((B + 1) // 2, 8)        # ceil(B/2) rounded up to 8 sublanes
        tb = min(block_b, half)

    grid = (pl.cdiv(B, tb),)

    kernel = functools.partial(_fused_encoder_kernel, p_tr=p_tr, p_re=p_re)

    out = pl.pallas_call(
        kernel,
        out_shape=jax.ShapeDtypeStruct((B, P), jnp.float32),
        grid_spec=pltpu.PrefetchScalarGridSpec(
            num_scalar_prefetch=0,
            grid=grid,
            in_specs=[
                pl.BlockSpec((tb, D_in), lambda i: (i, 0)),            # h: tiled over batch
                pl.BlockSpec(w1_cat.shape, lambda i: (0, 0)),          # weights: VMEM-resident
                pl.BlockSpec(w2_bd.shape, lambda i: (0, 0)),
                pl.BlockSpec(small_params.shape, lambda i: (0, 0)),
            ],
            out_specs=pl.BlockSpec((tb, P), lambda i: (i, 0)),
        ),
        compiler_params=pltpu.CompilerParams(
            dimension_semantics=("parallel",),   # shards batch tiles across TCs on v7x
        ),
    )(h, w1_cat, w2_bd, small_params)

    return out[:, :p_tr], out[:, p_tr:]


class CausalEncoderPallas:
    """Parameters initialized deterministically in-script (synthetic weights)."""

    def __init__(self, key, hidden_state_dim, action_dim, stoch_dim,
                 tr_proj_dim, re_proj_dim, hidden_dim, combined_input_dim,
                 embedding_mode="continuous"):
        self.embedding_mode = embedding_mode
        self.tr_proj_dim = tr_proj_dim
        self.re_proj_dim = re_proj_dim
        self.hidden_dim = hidden_dim
        input_dim = (combined_input_dim if combined_input_dim is not None
                     else hidden_state_dim + (action_dim or 0) + (stoch_dim or 0))
        self.input_dim = input_dim

        keys = jax.random.split(key, 8)

        def linear(k, fan_in, fan_out):
            # torch.nn.Linear default: U(-1/sqrt(fan_in), 1/sqrt(fan_in))
            lim = 1.0 / jnp.sqrt(jnp.float32(fan_in))
            kw, kb = jax.random.split(k)
            w = jax.random.uniform(kw, (fan_in, fan_out), jnp.float32, -lim, lim)
            b = jax.random.uniform(kb, (1, fan_out), jnp.float32, -lim, lim)
            return w, b

        # Per-branch parameters (kept for the pure-JAX reference check)
        self.tr_w1, self.tr_b1 = linear(keys[0], input_dim, hidden_dim)
        self.tr_w2, self.tr_b2 = linear(keys[1], hidden_dim, tr_proj_dim)
        self.re_w1, self.re_b1 = linear(keys[2], input_dim, hidden_dim)
        self.re_w2, self.re_b2 = linear(keys[3], hidden_dim, re_proj_dim)
        self.tr_gamma = jnp.ones((1, tr_proj_dim), jnp.float32)
        self.tr_beta = jnp.zeros((1, tr_proj_dim), jnp.float32)
        self.re_gamma = jnp.ones((1, re_proj_dim), jnp.float32)
        self.re_beta = jnp.zeros((1, re_proj_dim), jnp.float32)

        # ---- Fused / packed parameters used by the Pallas kernel ----
        H = hidden_dim
        P = tr_proj_dim + re_proj_dim
        H2 = 2 * H
        # W1: concat along output axis -> (D_in, 2H)
        self.w1_cat = jnp.concatenate([self.tr_w1, self.re_w1], axis=1)
        # W2: block diagonal -> (2H, P)
        w2_bd = jnp.zeros((H2, P), jnp.float32)
        w2_bd = w2_bd.at[:H, :tr_proj_dim].set(self.tr_w2)
        w2_bd = w2_bd.at[H:, tr_proj_dim:].set(self.re_w2)
        self.w2_bd = w2_bd
        # Small params packed into one (8, 128*k) array (full VMEM tile, lane-dense rows):
        # rows = [b1(2H), b2(P), gamma(P), beta(P), 0, 0, 0, 0]
        Wp = _round_up(max(H2, P), 128)
        sp = jnp.zeros((8, Wp), jnp.float32)
        sp = sp.at[0, :H2].set(jnp.concatenate([self.tr_b1, self.re_b1], axis=1)[0])
        sp = sp.at[1, :P].set(jnp.concatenate([self.tr_b2, self.re_b2], axis=1)[0])
        sp = sp.at[2, :P].set(jnp.concatenate([self.tr_gamma, self.re_gamma], axis=1)[0])
        sp = sp.at[3, :P].set(jnp.concatenate([self.tr_beta, self.re_beta], axis=1)[0])
        self.small_params = sp

        # Embedding tables exist in __init__ but are unused by the continuous forward.
        # TODO(synk): discrete-table lookup path (use_discrete_table) not exercised by this forward.
        self.tr_embed_table = jax.random.normal(keys[4], (256, tr_proj_dim), jnp.float32)
        self.re_embed_table = jax.random.normal(keys[5], (128, re_proj_dim), jnp.float32)

    def __call__(self, h):
        return fused_encode(h, self.w1_cat, self.w2_bd, self.small_params,
                            self.tr_proj_dim, self.re_proj_dim)


def _reference(enc, h):
    def branch(w1, b1, w2, b2, g, beta):
        z = h @ w1 + b1
        a = z * jax.nn.sigmoid(z)
        y = a @ w2 + b2
        mean = jnp.mean(y, axis=-1, keepdims=True)
        var = jnp.mean((y - mean) ** 2, axis=-1, keepdims=True)
        return (y - mean) / jnp.sqrt(var + LN_EPS) * g + beta
    tr = branch(enc.tr_w1, enc.tr_b1, enc.tr_w2, enc.tr_b2, enc.tr_gamma, enc.tr_beta)
    re = branch(enc.re_w1, enc.re_b1, enc.re_w2, enc.re_b2, enc.re_gamma, enc.re_beta)
    return tr, re


if __name__ == "__main__":
    key = jax.random.PRNGKey(0)
    k_param, k_input, k_input2 = jax.random.split(key, 3)

    # Small shapes consistent with the module
    hidden_state_dim = 16
    action_dim = 8
    stoch_dim = 8
    tr_proj_dim = 16
    re_proj_dim = 8
    hidden_dim = 32
    combined_input_dim = None  # -> input_dim = 16 + 8 + 8 = 32
    batch = 8

    enc = CausalEncoderPallas(k_param, hidden_state_dim, action_dim, stoch_dim,
                              tr_proj_dim, re_proj_dim, hidden_dim,
                              combined_input_dim, embedding_mode="continuous")

    # Case 1: tiny batch -> single full-array tile
    h = jax.random.normal(k_input, (batch, enc.input_dim), jnp.float32)
    tr, re = enc(h)
    jax.block_until_ready((tr, re))

    tr_ref, re_ref = _reference(enc, h)
    assert tr.shape == (batch, tr_proj_dim) and re.shape == (batch, re_proj_dim)
    assert jnp.allclose(tr, tr_ref, atol=2e-5, rtol=2e-5)
    assert jnp.allclose(re, re_ref, atol=2e-5, rtol=2e-5)

    # Case 2: non-divisible batch -> 2-tile grid + clipped partial last tile
    batch2 = 40
    h2 = jax.random.normal(k_input2, (batch2, enc.input_dim), jnp.float32)
    tr2, re2 = enc(h2)
    jax.block_until_ready((tr2, re2))
    tr2_ref, re2_ref = _reference(enc, h2)
    assert tr2.shape == (batch2, tr_proj_dim) and re2.shape == (batch2, re_proj_dim)
    assert jnp.allclose(tr2, tr2_ref, atol=2e-5, rtol=2e-5)
    assert jnp.allclose(re2, re2_ref, atol=2e-5, rtol=2e-5)

    print("KERNEL_OK")
</pallas_src>

<mosaic_0001>
module attributes {stable_mosaic.version = 11 : i64} {
  func.func @_fused_encoder_kernel(%arg0: i32, %arg1: memref<8x32xf32, #tpu.memory_space<vmem>>, %arg2: memref<32x64xf32, #tpu.memory_space<vmem>>, %arg3: memref<64x24xf32, #tpu.memory_space<vmem>>, %arg4: memref<8x128xf32, #tpu.memory_space<vmem>>, %arg5: memref<8x24xf32, #tpu.memory_space<vmem>>) attributes {dimension_semantics = [#tpu.dimension_semantics<parallel>], iteration_bounds = array<i64: 1>, scalar_prefetch = 0 : i64, scratch_operands = 0 : i64, tpu.core_type = #tpu.core_type<tc>, window_params = [{transform_indices = @transform_0, window_bounds = array<i64: 8, 32>}, {pipeline_mode = #tpu.pipeline_mode<synchronous>, transform_indices = @transform_1, window_bounds = array<i64: 32, 64>}, {pipeline_mode = #tpu.pipeline_mode<synchronous>, transform_indices = @transform_2, window_bounds = array<i64: 64, 24>}, {pipeline_mode = #tpu.pipeline_mode<synchronous>, transform_indices = @transform_3, window_bounds = array<i64: 8, 128>}, {transform_indices = @transform_4, window_bounds = array<i64: 8, 24>}]} {
    %c0 = arith.constant 0 : index
    %c0_0 = arith.constant 0 : index
    %0 = vector.load %arg1[%c0, %c0_0] : memref<8x32xf32, #tpu.memory_space<vmem>>, vector<8x32xf32>
    %c0_1 = arith.constant 0 : index
    %c0_2 = arith.constant 0 : index
    %1 = vector.load %arg4[%c0_1, %c0_2] : memref<8x128xf32, #tpu.memory_space<vmem>>, vector<1x128xf32>
    %2 = vector.extract_strided_slice %1 {offsets = [0, 0], sizes = [1, 64], strides = [1, 1]} : vector<1x128xf32> to vector<1x64xf32>
    %c1 = arith.constant 1 : index
    %c0_3 = arith.constant 0 : index
    %3 = vector.load %arg4[%c1, %c0_3] : memref<8x128xf32, #tpu.memory_space<vmem>>, vector<1x128xf32>
    %4 = vector.extract_strided_slice %3 {offsets = [0, 0], sizes = [1, 24], strides = [1, 1]} : vector<1x128xf32> to vector<1x24xf32>
    %c2 = arith.constant 2 : index
    %c0_4 = arith.constant 0 : index
    %5 = vector.load %arg4[%c2, %c0_4] : memref<8x128xf32, #tpu.memory_space<vmem>>, vector<1x128xf32>
    %6 = vector.extract_strided_slice %5 {offsets = [0, 0], sizes = [1, 24], strides = [1, 1]} : vector<1x128xf32> to vector<1x24xf32>
    %c3 = arith.constant 3 : index
    %c0_5 = arith.constant 0 : index
    %7 = vector.load %arg4[%c3, %c0_5] : memref<8x128xf32, #tpu.memory_space<vmem>>, vector<1x128xf32>
    %8 = vector.extract_strided_slice %7 {offsets = [0, 0], sizes = [1, 24], strides = [1, 1]} : vector<1x128xf32> to vector<1x24xf32>
    %c0_6 = arith.constant 0 : index
    %c0_7 = arith.constant 0 : index
    %9 = vector.load %arg2[%c0_6, %c0_7] : memref<32x64xf32, #tpu.memory_space<vmem>>, vector<32x64xf32>
    %cst = arith.constant dense<0.000000e+00> : vector<8x64xf32>
    %10 = tpu.matmul %0, %9, %cst {dimension_numbers = #tpu.dot_dimension_numbers<[1], [0], [0], [1], [0, 0, 1, 1], [], []>} : vector<8x32xf32>, vector<32x64xf32>, vector<8x64xf32> -> vector<8x64xf32>
    %11 = vector.broadcast %2 : vector<1x64xf32> to vector<8x64xf32>
    %12 = arith.addf %10, %11 : vector<8x64xf32>
    %13 = arith.negf %12 : vector<8x64xf32>
    %14 = math.exp %13 : vector<8x64xf32>
    %cst_8 = arith.constant 1.000000e+00 : f32
    %15 = vector.broadcast %cst_8 : f32 to vector<8x64xf32>
    %16 = arith.addf %15, %14 : vector<8x64xf32>
    %17 = arith.divf %15, %16 : vector<8x64xf32>
    %18 = arith.mulf %12, %17 : vector<8x64xf32>
    %c0_9 = arith.constant 0 : index
    %c0_10 = arith.constant 0 : index
    %19 = vector.load %arg3[%c0_9, %c0_10] : memref<64x24xf32, #tpu.memory_space<vmem>>, vector<64x24xf32>
    %cst_11 = arith.constant dense<0.000000e+00> : vector<8x24xf32>
    %20 = tpu.matmul %18, %19, %cst_11 {dimension_numbers = #tpu.dot_dimension_numbers<[1], [0], [0], [1], [0, 0, 1, 1], [], []>} : vector<8x64xf32>, vector<64x24xf32>, vector<8x24xf32> -> vector<8x24xf32>
    %21 = vector.broadcast %4 : vector<1x24xf32> to vector<8x24xf32>
    %22 = arith.addf %20, %21 : vector<8x24xf32>
    %23 = tpu.iota {dimensions = array<i32: 1>} : vector<8x24xi32>
    %c16_i32 = arith.constant 16 : i32
    %24 = vector.broadcast %c16_i32 : i32 to vector<8x24xi32>
    %25 = arith.cmpi slt, %23, %24 : vector<8x24xi32>
    %cst_12 = arith.constant 0.000000e+00 : f32
    %26 = vector.broadcast %cst_12 : f32 to vector<8x24xf32>
    %27 = arith.select %25, %22, %26 : vector<8x24xi1>, vector<8x24xf32>
    %cst_13 = arith.constant dense<0.000000e+00> : vector<8xf32>
    %28 = vector.multi_reduction <add>, %27, %cst_13 [1] : vector<8x24xf32> to vector<8xf32>
    %29 = vector.shape_cast %28 : vector<8xf32> to vector<8x1xf32>
    %30 = arith.select %25, %26, %22 : vector<8x24xi1>, vector<8x24xf32>
    %cst_14 = arith.constant dense<0.000000e+00> : vector<8xf32>
    %31 = vector.multi_reduction <add>, %30, %cst_14 [1] : vector<8x24xf32> to vector<8xf32>
    %32 = vector.shape_cast %31 : vector<8xf32> to vector<8x1xf32>
    %cst_15 = arith.constant 6.250000e-02 : f32
    %33 = vector.broadcast %cst_15 : f32 to vector<8x1xf32>
    %34 = arith.mulf %29, %33 : vector<8x1xf32>
    %cst_16 = arith.constant 1.250000e-01 : f32
    %35 = vector.broadcast %cst_16 : f32 to vector<8x1xf32>
    %36 = arith.mulf %32, %35 : vector<8x1xf32>
    %37 = vector.shape_cast %34 : vector<8x1xf32> to vector<8x1xf32>
    %38 = vector.broadcast %37 : vector<8x1xf32> to vector<8x24xf32>
    %39 = vector.shape_cast %36 : vector<8x1xf32> to vector<8x1xf32>
    %40 = vector.broadcast %39 : vector<8x1xf32> to vector<8x24xf32>
    %41 = arith.select %25, %38, %40 : vector<8x24xi1>, vector<8x24xf32>
    %42 = arith.subf %22, %41 : vector<8x24xf32>
    %43 = arith.mulf %42, %42 : vector<8x24xf32>
    %44 = arith.select %25, %43, %26 : vector<8x24xi1>, vector<8x24xf32>
    %cst_17 = arith.constant dense<0.000000e+00> : vector<8xf32>
    %45 = vector.multi_reduction <add>, %44, %cst_17 [1] : vector<8x24xf32> to vector<8xf32>
    %46 = vector.shape_cast %45 : vector<8xf32> to vector<8x1xf32>
    %47 = arith.select %25, %26, %43 : vector<8x24xi1>, vector<8x24xf32>
    %cst_18 = arith.constant dense<0.000000e+00> : vector<8xf32>
    %48 = vector.multi_reduction <add>, %47, %cst_18 [1] : vector<8x24xf32> to vector<8xf32>
    %49 = vector.shape_cast %48 : vector<8xf32> to vector<8x1xf32>
    %cst_19 = arith.constant 6.250000e-02 : f32
    %50 = vector.broadcast %cst_19 : f32 to vector<8x1xf32>
    %51 = arith.mulf %46, %50 : vector<8x1xf32>
    %cst_20 = arith.constant 1.250000e-01 : f32
    %52 = vector.broadcast %cst_20 : f32 to vector<8x1xf32>
    %53 = arith.mulf %49, %52 : vector<8x1xf32>
    %54 = vector.shape_cast %51 : vector<8x1xf32> to vector<8x1xf32>
    %55 = vector.broadcast %54 : vector<8x1xf32> to vector<8x24xf32>
    %56 = vector.shape_cast %53 : vector<8x1xf32> to vector<8x1xf32>
    %57 = vector.broadcast %56 : vector<8x1xf32> to vector<8x24xf32>
    %58 = arith.select %25, %55, %57 : vector<8x24xi1>, vector<8x24xf32>
    %cst_21 = arith.constant 9.99999974E-6 : f32
    %59 = vector.broadcast %cst_21 : f32 to vector<8x24xf32>
    %60 = arith.addf %58, %59 : vector<8x24xf32>
    %61 = math.rsqrt %60 : vector<8x24xf32>
    %62 = arith.mulf %42, %61 : vector<8x24xf32>
    %63 = vector.broadcast %6 : vector<1x24xf32> to vector<8x24xf32>
    %64 = arith.mulf %62, %63 : vector<8x24xf32>
    %65 = vector.broadcast %8 : vector<1x24xf32> to vector<8x24xf32>
    %66 = arith.addf %64, %65 : vector<8x24xf32>
    %c0_22 = arith.constant 0 : index
    %c0_23 = arith.constant 0 : index
    %67 = vector.load %arg5[%c0_22, %c0_23] : memref<8x24xf32, #tpu.memory_space<vmem>>, vector<8x24xf32>
    tpu.vector_store %arg5[%c0_22, %c0_23], %66 {strides = array<i32>} : memref<8x24xf32, #tpu.memory_space<vmem>>, vector<8x24xf32>,
    return
  }
  func.func @transform_0(%arg0: i32) -> (i32, i32) {
    %c0_i32 = arith.constant 0 : i32
    %c0_i32_0 = arith.constant 0 : i32
    return %arg0, %c0_i32 : i32, i32
  }
  func.func @transform_1(%arg0: i32) -> (i32, i32) {
    %c0_i32 = arith.constant 0 : i32
    %c0_i32_0 = arith.constant 0 : i32
    %c0_i32_1 = arith.constant 0 : i32
    return %c0_i32, %c0_i32_0 : i32, i32
  }
  func.func @transform_2(%arg0: i32) -> (i32, i32) {
    %c0_i32 = arith.constant 0 : i32
    %c0_i32_0 = arith.constant 0 : i32
    %c0_i32_1 = arith.constant 0 : i32
    return %c0_i32, %c0_i32_0 : i32, i32
  }
  func.func @transform_3(%arg0: i32) -> (i32, i32) {
    %c0_i32 = arith.constant 0 : i32
    %c0_i32_0 = arith.constant 0 : i32
    %c0_i32_1 = arith.constant 0 : i32
    return %c0_i32, %c0_i32_0 : i32, i32
  }
  func.func @transform_4(%arg0: i32) -> (i32, i32) {
    %c0_i32 = arith.constant 0 : i32
    %c0_i32_0 = arith.constant 0 : i32
    return %arg0, %c0_i32 : i32, i32
  }
}

</mosaic_0001>

<bundles_post_ra>
// kernel: tpu_custom_call.1
= control target key start
LH: loop header
LB: loop body
LE: loop exit
PB: predicated region body
PF: predicated region fallthrough
CT: control target
= control target key end

     0   :  { %s297_s0 = inlined_call_operand.vmem [shape: f32[8,32], index: 0, kind: input, shape index: {}]   ;;  %s298_s1 = inlined_call_operand.vmem [shape: f32[32,64], index: 1, kind: input, shape index: {}]   ;;  %s299_s2 = inlined_call_operand.vmem [shape: f32[64,24], index: 2, kind: input, shape index: {}]   ;;  %s300_s3 = inlined_call_operand.vmem [shape: f32[8,128], index: 3, kind: input, shape index: {}]   ;;  %s301_s4 = inlined_call_operand.hbm [shape: f32[8,24], index: 4, kind: output, shape index: {}]  }
   0x1   :  { %v26_v0 = vld [vmem:[%s298_s1 + $0x18] sm:$0xff]  ;;  %v25_v1 = vld [vmem:[%s298_s1 + $0x10] sm:$0xff]  ;;  %v24_v2 = vld [vmem:[%s298_s1 + $0x8] sm:$0xff] }
   0x2   :  { %44 = vmatpush.msra.mxu0 %v26_v0 }
   0x3   :  { %9 = vsyncpa [#allocation3], 0  ;;  %v23_v3 = vld [vmem:[%s298_s1] sm:$0xff]  ;;  %vm28_vm0 = vcmask 261120   ;;  %v79_v5 = vld [vmem:[%s299_s2 + $0x38] sm:$0xff]  ;;  %vm81_vm5 = vcmask 523264   ;;  %v105_v30 = vlaneseq }
   0x4   :  { %45 = vmatpush.msra.mxu0 %v25_v1  ;;  %v18_v4 = vld [vmem:[%s297_s0] sm:$0xff]  ;;  %93 = vmatpush.msra.mxu1 %v79_v5  ;;  %v78_v6 = vld [vmem:[%s299_s2 + $0x30] sm:$0xff]  ;;  %v77_v7 = vld [vmem:[%s299_s2 + $0x28] sm:$0xff]  ;;  %vm109_vm7 = vcmask 195584   ;;  %s206_s20 = smov [#allocation2]   ;;  %s157_s24 = sshll.u32 %s301_s4, 4  ;;  %s158_s24 = int_to_ptr.hbm [resolvable:$true] %s157_s24 }
   0x5   :  { %v76_v8 = vld [vmem:[%s299_s2 + $0x20] sm:$0xff]  ;;  %v75_v9 = vld [vmem:[%s299_s2 + $0x18] sm:$0xff]  ;;  %v74_v10 = vld [vmem:[%s299_s2 + $0x10] sm:$0xff]  ;;  %v106_v31 = vand.u32 127, %v105_v30  ;;  %s155_s21 = sshll.u32 %s206_s20, 4  ;;  %s156_s21 = int_to_ptr.vmem [resolvable:$true] %s155_s21 }
   0x6   :  { %46 = vmatpush.msra.mxu0 %v24_v2  ;;  %94 = vmatpush.msra.mxu1 %v78_v6  ;;  %v170_v11 = vld [vmem:[%s300_s3] ss:$0 sm:$0xff]  ;;  %v73_v12 = vld [vmem:[%s299_s2 + $0x8] sm:$0xff]  ;;  %v171_v32 = vld [vmem:[%s300_s3 + $0x1] ss:$0 sm:$0xff] }
   0x7   :  { %v72_v13 = vld [vmem:[%s299_s2] sm:$0xff]  ;;  %vm107_vm6 = vcmp.lt.s32.totalorder %v106_v31, 16 }
   0x8   :  { %47 = vmatpush.msra.mxu0 %v23_v3  ;;  %95 = vmatpush.msra.mxu1 %v77_v7  ;;  %v172_v62 = vld [vmem:[%s300_s3 + $0x2] ss:$0 sm:$0xff]  ;;  %v173_v1 = vld [vmem:[%s300_s3 + $0x3] ss:$0 sm:$0xff] }
   0x9   :  { %166 = vmatmul.msk.f32.vlgmr.msra.gmra.mxu0 %vm28_vm0, %v18_v4 }
   0xa   :  { %96 = vmatpush.msra.mxu1 %v76_v8 }
   0xc   :  { %97 = vmatpush.msra.mxu1 %v75_v9 }
   0xe   :  { %98 = vmatpush.msra.mxu1 %v74_v10 }
  0x10   :  { %99 = vmatpush.msra.mxu1 %v73_v12 }
  0x12   :  { %100 = vmatpush.msra.mxu1 %v72_v13 }
  0x86   :  { %v49_v14 = vpop.f32.mrf.mxu0 }
  0x87   :  { %v50_v15 = vadd.f32 %v170_v11, %v49_v14 }
  0x89   :  { %v167_v16 = vmul.f32 -1.442695, %v50_v15 }
  0x8b   :  { %174 = vpow2.f32 %v167_v16 }
  0x91   :  { %v175_v17 = vpop.eup %174 }
  0x92   :  { %v55_v18 = vadd.f32 1.0, %v175_v17 }
  0x94   :  { %176 = vrcp.f32 %v55_v18  ;;  %v67_v22 = vand.u32 2147483648, %v55_v18  ;;  %v65_v24 = vand.u32 2147483647, %v55_v18  ;;  %vm61_vm2 = vweird.f32 %v55_v18 }
  0x96   :  { %v68_v26 = vor.u32 1.1754944e-38, %v67_v22  ;;  %vm66_vm4 = vcmp.eq.f32.partialorder %v65_v24, 8.507059e+37 }
  0x9a   :  { %v177_v19 = vpop.eup %176 }
  0x9b   :  { %v57_v20 = vmul.f32 %v177_v19, %v55_v18  ;;  %vm62_vm1 = vweird.f32 %v177_v19 }
  0x9c   :  { %vm63_vm3 = vmor %vm61_vm2, %vm62_vm1 }
  0x9d   :  { %v58_v21 = vsub.f32 1.0, %v57_v20 }
  0x9f   :  { %v59_v23 = vmul.f32 %v177_v19, %v58_v21 }
  0xa1   :  { %v60_v25 = vadd.f32 %v177_v19, %v59_v23 }
  0xa3   :  { %v64_v27 = vsel %vm63_vm3, %v177_v19, %v60_v25 }
  0xa4   :  { %v69_v28 = vsel %vm66_vm4, %v68_v26, %v64_v27 }
  0xa5   :  { %v71_v29 = vmul.f32 %v69_v28, %v50_v15 }
  0xa7   :  { %168 = vmatmul.msk.f32.vlgmr.msra.gmra.mxu1 %vm81_vm5, %v71_v29 }
 0x124   :  { %v102_v33 = vpop.f32.mrf.mxu1 }
 0x125   :  { %v103_v34 = vadd.f32 %v171_v32, %v102_v33 }
 0x127   :  { %v108_v35 = vsel %vm107_vm6, %v103_v34, 0.0  ;;  %v113_v37 = vsel %vm107_vm6, 0.0, %v103_v34 }
 0x128   :  { %v110_v36 = vsel %vm109_vm7, %v108_v35, 0.0  ;;  %v114_v38 = vsel %vm109_vm7, %v113_v37, 0.0 }
 0x129   :  { %111 = vadd.xlane.f32.xlu0 %v110_v36 }
 0x131   :  { %115 = vadd.xlane.f32.xlu0 %v114_v38 }
 0x19c   :  { %v112_v39 = vpop.xlane.xlu0 %111 }
 0x19d   :  { %v117_v41 = vmul.f32 0.0625, %v112_v39 }
 0x1a4   :  { %v116_v40 = vpop.xlane.xlu0 %115 }
 0x1a5   :  { %v118_v42 = vmul.f32 0.125, %v116_v40 }
 0x1a7   :  { %v119_v43 = vsel %vm107_vm6, %v117_v41, %v118_v42 }
 0x1a8   :  { %v120_v44 = vsub.f32 %v103_v34, %v119_v43 }
 0x1aa   :  { %v121_v45 = vmul.f32 %v120_v44, %v120_v44 }
 0x1ac   :  { %v122_v46 = vsel %vm107_vm6, %v121_v45, 0.0  ;;  %v126_v48 = vsel %vm107_vm6, 0.0, %v121_v45 }
 0x1ad   :  { %v123_v47 = vsel %vm109_vm7, %v122_v46, 0.0  ;;  %v127_v49 = vsel %vm109_vm7, %v126_v48, 0.0 }
 0x1ae   :  { %124 = vadd.xlane.f32.xlu1 %v123_v47 }
 0x1b6   :  { %128 = vadd.xlane.f32.xlu1 %v127_v49 }
 0x221   :  { %v125_v50 = vpop.xlane.xlu1 %124 }
 0x222   :  { %v130_v52 = vmul.f32 0.0625, %v125_v50 }
 0x229   :  { %v129_v51 = vpop.xlane.xlu1 %128 }
 0x22a   :  { %v131_v53 = vmul.f32 0.125, %v129_v51 }
 0x22c   :  { %v132_v54 = vsel %vm107_vm6, %v130_v52, %v131_v53 }
 0x22d   :  { %v133_v55 = vadd.f32 1e-05, %v132_v54 }
 0x22f   :  { %178 = vrsqrt.f32 %v133_v55  ;;  %vm140_vm9 = vweird.f32 %v133_v55 }
 0x235   :  { %v179_v56 = vpop.eup %178 }
 0x236   :  { %v135_v57 = vmul.f32 %v179_v56, %v133_v55  ;;  %vm141_vm8 = vweird.f32 %v179_v56 }
 0x237   :  { %vm142_vm10 = vmor %vm140_vm9, %vm141_vm8 }
 0x238   :  { %v136_v58 = vmul.f32 %v179_v56, %v135_v57 }
 0x23a   :  { %v137_v59 = vmul.f32 0.5, %v136_v58 }
 0x23c   :  { %v138_v60 = vsub.f32 1.5, %v137_v59 }
 0x23e   :  { %v139_v61 = vmul.f32 %v179_v56, %v138_v60 }
 0x240   :  { %v143_v63 = vsel %vm142_vm10, %v179_v56, %v139_v61 }
 0x241   :  { %v144_v0 = vmul.f32 %v143_v63, %v120_v44 }
 0x243   :  { %v146_v2 = vmul.f32 %v172_v62, %v144_v0 }
 0x245   :  { %v148_v3 = vadd.f32 %v173_v1, %v146_v2 }
 0x247   :  { %149 = vst.msk [vmem:[#allocation2] sm:$0xff] %vm109_vm7, %v148_v3 }
 0x248   :  { %160 = dma.vmem_to_hbm [thread:$0]  %s156_s21, 128, %s158_s24, [#allocation3]  }
 0x249   :  { %204 = dma.done.wait [#allocation3], 128  }
 0x24a   :  { %205 = vsyncadd [#allocation3], 4294967168 }
 0x24b   :  { %165 = vsyncpa [#allocation3], 1 }

</bundles_post_ra>
